<compile_context>
chip_gen: v7x
topology: tpu7x:2x2x1
jax: 0.10.0
libtpu: 0.0.40
codegen_flags: <defaults>
</compile_context>

<pallas_src>
import functools

import jax
import jax.numpy as jnp
from jax import lax
from jax.experimental import pallas as pl
from jax.experimental.pallas import tpu as pltpu


def _round_up(n, m):
    return ((n + m - 1) // m) * m


def _sigmoid(x):
    return 1.0 / (1.0 + jnp.exp(-x))


def _bernstein_kan_kernel(x_ref, wt_ref, params_ref, o_ref, *, o_real, eps):
    # x tile: (BB, I) f32
    x = x_ref[...]
    sig = _sigmoid(x)
    silu_x = x * sig

    p = params_ref[...]                      # (4, O_pad) f32
    bias = p[0:1, :]                         # sum_{i,d} coeffs  (0 on padded lanes)
    gamma = p[1:2, :]                        # LayerNorm weight  (0 on padded lanes)
    beta = p[2:3, :]                         # LayerNorm bias    (0 on padded lanes)
    mask = p[3:4, :]                         # 1 on real output lanes, 0 on padding

    # Single fused MXU matmul (K = input_dim, N = O_pad); f32 accumulation.
    z = jnp.dot(silu_x.astype(wt_ref.dtype), wt_ref[...],
                preferred_element_type=jnp.float32) + bias       # (BB, O_pad)

    # Masked LayerNorm over the real output features only.
    # Padded lanes of z are exactly 0 (zero-padded weights + zero bias), so the
    # plain sum already equals the sum over real lanes.
    inv_n = 1.0 / o_real
    mean = jnp.sum(z, axis=-1, keepdims=True) * inv_n            # (BB, 1)
    zc = (z - mean) * mask                                       # 0 on padded lanes
    var = jnp.sum(zc * zc, axis=-1, keepdims=True) * inv_n       # (BB, 1)
    scale = gamma * lax.rsqrt(var + eps)                         # gamma folded in
    zn = zc * scale + beta                                       # padded lanes -> 0

    # Final SiLU (padded lanes stay 0); lane-dense store of the whole tile.
    o_ref[...] = zn * _sigmoid(zn)


def bernstein_kan_forward(x, base_weights, bernstein_coeffs, ln_gamma, ln_beta,
                          degree, *, block_b=512, matmul_dtype=jnp.float32,
                          eps=1e-5):
    output_dim, input_dim = base_weights.shape
    xf = jnp.reshape(x, (-1, input_dim)).astype(jnp.float32)
    B = xf.shape[0]

    # Lane-dense output: pad O up to a multiple of 128.
    o_pad = _round_up(output_dim, 128)
    pad_o = o_pad - output_dim

    # Batch tiling: clamp the tile to the (8-aligned) batch, pad batch to a
    # whole number of tiles, strip padding afterwards.
    bb = min(block_b, _round_up(B, 8))
    b_pad = _round_up(B, bb)
    if b_pad != B:
        xf = jnp.pad(xf, ((0, b_pad - B), (0, 0)))

    # The reference's de Casteljau recurrence starts from all-ones, so every
    # basis value is exactly 1 and the einsum collapses to a per-output bias.
    bias = jnp.sum(bernstein_coeffs.astype(jnp.float32), axis=(0, 2))  # (O,)

    wt = base_weights.T.astype(matmul_dtype)                       # (I, O)
    wt = jnp.pad(wt, ((0, 0), (0, pad_o)))                          # (I, O_pad)

    params = jnp.stack([
        jnp.pad(bias, (0, pad_o)),
        jnp.pad(ln_gamma.astype(jnp.float32), (0, pad_o)),
        jnp.pad(ln_beta.astype(jnp.float32), (0, pad_o)),
        jnp.pad(jnp.ones((output_dim,), jnp.float32), (0, pad_o)),
    ], axis=0)                                                      # (4, O_pad)

    kernel = functools.partial(_bernstein_kan_kernel, o_real=output_dim, eps=eps)

    out = pl.pallas_call(
        kernel,
        out_shape=jax.ShapeDtypeStruct((b_pad, o_pad), jnp.float32),
        grid_spec=pltpu.PrefetchScalarGridSpec(
            num_scalar_prefetch=0,
            grid=(b_pad // bb,),
            in_specs=[
                pl.BlockSpec((bb, input_dim), lambda i: (i, 0)),
                pl.BlockSpec((input_dim, o_pad), lambda i: (0, 0)),
                pl.BlockSpec((4, o_pad), lambda i: (0, 0)),
            ],
            out_specs=pl.BlockSpec((bb, o_pad), lambda i: (i, 0)),
        ),
        compiler_params=pltpu.CompilerParams(
            dimension_semantics=("parallel",),
            vmem_limit_bytes=32 * 1024 * 1024,
        ),
    )(xf, wt, params)
    return out[:B, :output_dim]


def _reference(x, base_weights, bernstein_coeffs, ln_gamma, ln_beta, degree):
    """Pure-JAX re-implementation of the PyTorch forward (for verification).

    Keeps the module's literal recurrence (all-ones control points) so the
    bias-collapse in the kernel wrapper is validated against the real thing.
    """
    output_dim, input_dim = base_weights.shape
    xf = jnp.reshape(x, (-1, input_dim)).astype(jnp.float32)
    sig = _sigmoid(xf)
    basis = (xf * sig) @ base_weights.T
    s = sig
    bern = [jnp.ones_like(xf) for _ in range(degree + 1)]
    for j in range(1, degree + 1):
        new = list(bern)
        for k in range(degree + 1 - j):
            new[k] = bern[k] * (1.0 - s) + bern[k + 1] * s
        bern = new
    bern_full = jnp.stack(bern, axis=-1)                   # (B, I, D+1)
    y = jnp.einsum('bid,iod->bo', bern_full, bernstein_coeffs)
    z = y + basis
    mean = jnp.mean(z, axis=-1, keepdims=True)
    var = jnp.mean((z - mean) ** 2, axis=-1, keepdims=True)
    zn = (z - mean) / jnp.sqrt(var + 1e-5)
    zn = zn * ln_gamma[None, :] + ln_beta[None, :]
    return zn * _sigmoid(zn)


if __name__ == "__main__":
    input_dim, output_dim, degree = 32, 16, 5

    key = jax.random.PRNGKey(0)
    k_x, k_w, k_c = jax.random.split(key, 3)

    # Example input: any leading shape, flattened to (-1, input_dim) -> B = 16.
    x = jax.random.normal(k_x, (2, 8, input_dim), dtype=jnp.float32)

    # Deterministic parameter init mirroring the module's __init__:
    # xavier_uniform_(base_weights)  (shape (O, I), fan_in=I, fan_out=O)
    bound = (6.0 / (input_dim + output_dim)) ** 0.5
    base_weights = jax.random.uniform(
        k_w, (output_dim, input_dim), jnp.float32, -bound, bound)
    # normal_(bernstein_coeffs, std = 1/(I*(D+1)))
    std = 1.0 / (input_dim * (degree + 1))
    bernstein_coeffs = std * jax.random.normal(
        k_c, (input_dim, output_dim, degree + 1), dtype=jnp.float32)
    # LayerNorm default affine params
    ln_gamma = jnp.ones((output_dim,), jnp.float32)
    ln_beta = jnp.zeros((output_dim,), jnp.float32)

    ref = _reference(x, base_weights, bernstein_coeffs, ln_gamma, ln_beta, degree)

    # f32 matmul path (default): strict check against the reference.
    out = bernstein_kan_forward(x, base_weights, bernstein_coeffs,
                                ln_gamma, ln_beta, degree)
    out = jax.block_until_ready(out)
    assert out.shape == (16, output_dim)
    assert jnp.allclose(out, ref, atol=1e-5, rtol=1e-5), "f32 mismatch vs. reference"

    # bf16 matmul path (recommended on v6e/v7x): loose check.
    out_bf16 = bernstein_kan_forward(x, base_weights, bernstein_coeffs,
                                     ln_gamma, ln_beta, degree,
                                     matmul_dtype=jnp.bfloat16)
    out_bf16 = jax.block_until_ready(out_bf16)
    assert out_bf16.shape == (16, output_dim)
    assert jnp.allclose(out_bf16, ref, atol=5e-2, rtol=5e-2), "bf16 mismatch vs. reference"

    print("KERNEL_OK")
</pallas_src>

<mosaic_0001>
module attributes {stable_mosaic.version = 11 : i64} {
  func.func @_bernstein_kan_kernel(%arg0: i32, %arg1: memref<16x32xf32, #tpu.memory_space<vmem>>, %arg2: memref<32x128xf32, #tpu.memory_space<vmem>>, %arg3: memref<4x128xf32, #tpu.memory_space<vmem>>, %arg4: memref<16x128xf32, #tpu.memory_space<vmem>>) attributes {dimension_semantics = [#tpu.dimension_semantics<parallel>], iteration_bounds = array<i64: 1>, scalar_prefetch = 0 : i64, scratch_operands = 0 : i64, tpu.core_type = #tpu.core_type<tc>, window_params = [{transform_indices = @transform_0, window_bounds = array<i64: 16, 32>}, {pipeline_mode = #tpu.pipeline_mode<synchronous>, transform_indices = @transform_1, window_bounds = array<i64: 32, 128>}, {pipeline_mode = #tpu.pipeline_mode<synchronous>, transform_indices = @transform_2, window_bounds = array<i64: 4, 128>}, {transform_indices = @transform_3, window_bounds = array<i64: 16, 128>}]} {
    %c0 = arith.constant 0 : index
    %c0_0 = arith.constant 0 : index
    %0 = vector.load %arg1[%c0, %c0_0] : memref<16x32xf32, #tpu.memory_space<vmem>>, vector<16x32xf32>
    %cst = arith.constant 0.000000e+00 : f32
    %1 = vector.broadcast %cst : f32 to vector<16x32xf32>
    %2 = arith.subf %1, %0 : vector<16x32xf32>
    %3 = math.exp %2 : vector<16x32xf32>
    %cst_1 = arith.constant 1.000000e+00 : f32
    %4 = vector.broadcast %cst_1 : f32 to vector<16x32xf32>
    %5 = arith.addf %4, %3 : vector<16x32xf32>
    %cst_2 = arith.constant 1.000000e+00 : f32
    %6 = vector.broadcast %cst_2 : f32 to vector<16x32xf32>
    %7 = arith.divf %6, %5 : vector<16x32xf32>
    %8 = arith.mulf %0, %7 : vector<16x32xf32>
    %c0_3 = arith.constant 0 : index
    %c0_4 = arith.constant 0 : index
    %9 = vector.load %arg3[%c0_3, %c0_4] : memref<4x128xf32, #tpu.memory_space<vmem>>, vector<4x128xf32>
    %10 = vector.extract_strided_slice %9 {offsets = [0, 0], sizes = [1, 128], strides = [1, 1]} : vector<4x128xf32> to vector<1x128xf32>
    %11 = vector.extract_strided_slice %9 {offsets = [1, 0], sizes = [1, 128], strides = [1, 1]} : vector<4x128xf32> to vector<1x128xf32>
    %12 = vector.extract_strided_slice %9 {offsets = [2, 0], sizes = [1, 128], strides = [1, 1]} : vector<4x128xf32> to vector<1x128xf32>
    %13 = vector.extract_strided_slice %9 {offsets = [3, 0], sizes = [1, 128], strides = [1, 1]} : vector<4x128xf32> to vector<1x128xf32>
    %c0_5 = arith.constant 0 : index
    %c0_6 = arith.constant 0 : index
    %14 = vector.load %arg2[%c0_5, %c0_6] : memref<32x128xf32, #tpu.memory_space<vmem>>, vector<32x128xf32>
    %cst_7 = arith.constant dense<0.000000e+00> : vector<16x128xf32>
    %15 = tpu.matmul %8, %14, %cst_7 {dimension_numbers = #tpu.dot_dimension_numbers<[1], [0], [0], [1], [0, 0, 1, 1], [], []>} : vector<16x32xf32>, vector<32x128xf32>, vector<16x128xf32> -> vector<16x128xf32>
    %16 = vector.broadcast %10 : vector<1x128xf32> to vector<16x128xf32>
    %17 = arith.addf %15, %16 : vector<16x128xf32>
    %cst_8 = arith.constant dense<0.000000e+00> : vector<16xf32>
    %18 = vector.multi_reduction <add>, %17, %cst_8 [1] : vector<16x128xf32> to vector<16xf32>
    %19 = vector.shape_cast %18 : vector<16xf32> to vector<16x1xf32>
    %cst_9 = arith.constant 6.250000e-02 : f32
    %20 = vector.broadcast %cst_9 : f32 to vector<16x1xf32>
    %21 = arith.mulf %19, %20 : vector<16x1xf32>
    %22 = vector.broadcast %21 : vector<16x1xf32> to vector<16x128xf32>
    %23 = arith.subf %17, %22 : vector<16x128xf32>
    %24 = vector.broadcast %13 : vector<1x128xf32> to vector<16x128xf32>
    %25 = arith.mulf %23, %24 : vector<16x128xf32>
    %26 = arith.mulf %25, %25 : vector<16x128xf32>
    %cst_10 = arith.constant dense<0.000000e+00> : vector<16xf32>
    %27 = vector.multi_reduction <add>, %26, %cst_10 [1] : vector<16x128xf32> to vector<16xf32>
    %28 = vector.shape_cast %27 : vector<16xf32> to vector<16x1xf32>
    %cst_11 = arith.constant 6.250000e-02 : f32
    %29 = vector.broadcast %cst_11 : f32 to vector<16x1xf32>
    %30 = arith.mulf %28, %29 : vector<16x1xf32>
    %cst_12 = arith.constant 9.99999974E-6 : f32
    %31 = vector.broadcast %cst_12 : f32 to vector<16x1xf32>
    %32 = arith.addf %30, %31 : vector<16x1xf32>
    %33 = math.rsqrt %32 : vector<16x1xf32>
    %34 = vector.broadcast %11 : vector<1x128xf32> to vector<16x128xf32>
    %35 = vector.broadcast %33 : vector<16x1xf32> to vector<16x128xf32>
    %36 = arith.mulf %34, %35 : vector<16x128xf32>
    %37 = arith.mulf %25, %36 : vector<16x128xf32>
    %38 = vector.broadcast %12 : vector<1x128xf32> to vector<16x128xf32>
    %39 = arith.addf %37, %38 : vector<16x128xf32>
    %cst_13 = arith.constant 0.000000e+00 : f32
    %40 = vector.broadcast %cst_13 : f32 to vector<16x128xf32>
    %41 = arith.subf %40, %39 : vector<16x128xf32>
    %42 = math.exp %41 : vector<16x128xf32>
    %cst_14 = arith.constant 1.000000e+00 : f32
    %43 = vector.broadcast %cst_14 : f32 to vector<16x128xf32>
    %44 = arith.addf %43, %42 : vector<16x128xf32>
    %cst_15 = arith.constant 1.000000e+00 : f32
    %45 = vector.broadcast %cst_15 : f32 to vector<16x128xf32>
    %46 = arith.divf %45, %44 : vector<16x128xf32>
    %47 = arith.mulf %39, %46 : vector<16x128xf32>
    %c0_16 = arith.constant 0 : index
    %c0_17 = arith.constant 0 : index
    %48 = vector.load %arg4[%c0_16, %c0_17] : memref<16x128xf32, #tpu.memory_space<vmem>>, vector<16x128xf32>
    tpu.vector_store %arg4[%c0_16, %c0_17], %47 {strides = array<i32>} : memref<16x128xf32, #tpu.memory_space<vmem>>, vector<16x128xf32>,
    return
  }
  func.func @transform_0(%arg0: i32) -> (i32, i32) {
    %c0_i32 = arith.constant 0 : i32
    %c0_i32_0 = arith.constant 0 : i32
    return %arg0, %c0_i32 : i32, i32
  }
  func.func @transform_1(%arg0: i32) -> (i32, i32) {
    %c0_i32 = arith.constant 0 : i32
    %c0_i32_0 = arith.constant 0 : i32
    %c0_i32_1 = arith.constant 0 : i32
    return %c0_i32, %c0_i32_0 : i32, i32
  }
  func.func @transform_2(%arg0: i32) -> (i32, i32) {
    %c0_i32 = arith.constant 0 : i32
    %c0_i32_0 = arith.constant 0 : i32
    %c0_i32_1 = arith.constant 0 : i32
    return %c0_i32, %c0_i32_0 : i32, i32
  }
  func.func @transform_3(%arg0: i32) -> (i32, i32) {
    %c0_i32 = arith.constant 0 : i32
    %c0_i32_0 = arith.constant 0 : i32
    return %arg0, %c0_i32 : i32, i32
  }
}

</mosaic_0001>

<bundles_post_ra>
// kernel: tpu_custom_call.1
= control target key start
LH: loop header
LB: loop body
LE: loop exit
PB: predicated region body
PF: predicated region fallthrough
CT: control target
= control target key end

     0   :  { %8 = vsyncpa [#allocation3], 0  ;;  %s421_s0 = inlined_call_operand.hbm [shape: f32[16,32], index: 0, kind: input, shape index: {}]   ;;  %s422_s1 = inlined_call_operand.hbm [shape: f32[32,128], index: 1, kind: input, shape index: {}]   ;;  %s423_s2 = inlined_call_operand.vmem [shape: f32[4,128], index: 2, kind: input, shape index: {}]   ;;  %s424_s3 = inlined_call_operand.hbm [shape: f32[16,128], index: 3, kind: output, shape index: {}]  }
   0x1   :  { %9 = vsyncpa [#allocation6], 0 }
   0x2   :  { %10 = vsyncpa [#allocation4], 0  ;;  %s348_s12 = smov [#allocation2]   ;;  %s276_s16 = scalar_lea.hbm %s421_s0, 256 }
   0x3   :  { %s16_s13 = sshll.u32 %s348_s12, 4  ;;  %p277_p0 = scmp.ne.s32.totalorder %s421_s0, %s276_s16  ;;  %s17_s13 = int_to_ptr.vmem [resolvable:$true] %s16_s13 }
   0x4   :  { %p280_p1 = scmp.lt.u32.totalorder %s276_s16, %s421_s0 }
   0x6   :  { %p282_p2 = pnand %p280_p1, %p277_p0 }
   0x8   :  { %285 = shalt.err (!%p282_p2)
}
   0x9   :  { %s286_s21 = scalar_lea.vmem %s17_s13, 256  ;;  %p291_p4 = scmp.lt.s32.totalorder %s17_s13, %s17_s13 }
   0xa   :  { %p287_p3 = scmp.ne.s32.totalorder %s17_s13, %s286_s21  ;;  %p292_p5 = scmp.lt.s32.totalorder %s286_s21, %s286_s21 }
   0xc   :  { %p293_p6 = por %p292_p5, %p291_p4 }
   0xe   :  { %p294_p7 = pnand %p293_p6, %p287_p3 }
  0x10   :  { %297 = shalt.err (!%p294_p7)
}
  0x11   :  { %s349_s22 = smov 128   ;;  %s350_s23 = smov 8  }
  0x12   :  { %22 = dma.hbm_to_vmem [thread:$0]  %s421_s0, 256, %s17_s13, [#allocation3], %s349_s22, %s349_s22, %s350_s23  }
  0x13   :  { %s351_s26 = smov [#allocation5]   ;;  %s298_s30 = scalar_lea.hbm %s422_s1, 512 }
  0x14   :  { %s28_s27 = sshll.u32 %s351_s26, 4  ;;  %p299_p8 = scmp.ne.s32.totalorder %s422_s1, %s298_s30  ;;  %s29_s27 = int_to_ptr.vmem [resolvable:$true] %s28_s27 }
  0x15   :  { %p302_p9 = scmp.lt.u32.totalorder %s298_s30, %s422_s1 }
  0x17   :  { %p304_p10 = pnand %p302_p9, %p299_p8 }
  0x19   :  { %307 = shalt.err (!%p304_p10)
}
  0x1a   :  { %s308_s8 = scalar_lea.vmem %s29_s27, 512  ;;  %p313_p12 = scmp.lt.s32.totalorder %s29_s27, %s29_s27 }
  0x1b   :  { %p309_p11 = scmp.ne.s32.totalorder %s29_s27, %s308_s8  ;;  %p314_p13 = scmp.lt.s32.totalorder %s308_s8, %s308_s8 }
  0x1d   :  { %p315_p0 = por %p314_p13, %p313_p12 }
  0x1f   :  { %p316_p1 = pnand %p315_p0, %p309_p11 }
  0x21   :  { %319 = shalt.err (!%p316_p1)
}
  0x22   :  { %34 = dma.hbm_to_vmem [thread:$0]  %s422_s1, 512, %s29_s27, [#allocation6], %s349_s22, %s349_s22, %s350_s23  }
  0x23   :  { %342 = dma.done.wait [#allocation3], 256  }
  0x24   :  { %343 = vsyncadd [#allocation3], 4294967040 }
  0x25   :  { %344 = dma.done.wait [#allocation6], 512  }
  0x26   :  { %345 = vsyncadd [#allocation6], 4294966784  ;;  %v60_v0 = vld [vmem:[#allocation5] sm:$0xff]  ;;  %v61_v1 = vld [vmem:[#allocation5 + $0x8] sm:$0xff]  ;;  %vm68_vm0 = vcmask 261120   ;;  %v64_v20 = vlaneseq }
  0x27   :  { %v62_v2 = vld [vmem:[#allocation5 + $0x10] sm:$0xff]  ;;  %v243_v3 = vpack.c.bf16 %v61_v1, %v60_v0  ;;  %v63_v4 = vld [vmem:[#allocation5 + $0x18] sm:$0xff] }
  0x28   :  { %v43_v5 = vld [vmem:[#allocation2] sm:$0xff]  ;;  %v44_v6 = vld [vmem:[#allocation2 + $0x8] sm:$0xff]  ;;  %v247_v7 = vpack.c.bf16 %v63_v4, %v62_v2  ;;  %v65_v21 = vshrl.u32 %v64_v20, 7 }
  0x29   :  { %v45_v8 = vsub.f32 0.0, %v43_v5  ;;  %v46_v9 = vsub.f32 0.0, %v44_v6  ;;  %244 = vmatprep.subr.bf16.mxu0 %v243_v3  ;;  %v59_v23 = vld [vmem:[%s423_s2] sm:$0xf]  ;;  %s352_s2 = smov [#allocation7]  }
  0x2a   :  { %246 = vmatpush3.bf16.msra.mxu0 %v243_v3  ;;  %v66_v22 = vsub.s32 0, %v65_v21  ;;  %v160_v29 = vsub.s32 3, %v65_v21  ;;  %v178_v47 = vsub.s32 1, %v65_v21  ;;  %v186_v49 = vsub.s32 2, %v65_v21  ;;  %s211_s11 = sshll.u32 %s352_s2, 4  ;;  %s212_s11 = int_to_ptr.vmem [resolvable:$true] %s211_s11 }
  0x2b   :  { %v47_v10 = vmul.f32 1.442695, %v45_v8  ;;  %v49_v11 = vmul.f32 1.442695, %v46_v9  ;;  %248 = vmatprep.subr.bf16.mxu0 %v247_v7  ;;  %s320_s12 = scalar_lea.vmem %s212_s11, 256  ;;  %p325_p3 = scmp.lt.s32.totalorder %s212_s11, %s212_s11 }
  0x2c   :  { %v67_v24 = vrot.slane %v59_v23, %v66_v22  ;;  %v161_v32 = vrot.slane %v59_v23, %v160_v29  ;;  %v179_v48 = vrot.slane %v59_v23, %v178_v47  ;;  %v187_v52 = vrot.slane %v59_v23, %v186_v49  ;;  %p321_p2 = scmp.ne.s32.totalorder %s212_s11, %s320_s12  ;;  %p326_p4 = scmp.lt.s32.totalorder %s320_s12, %s320_s12 }
  0x2d   :  { %256 = vpow2.f32 %v47_v10 }
  0x2e   :  { %258 = vpow2.f32 %v49_v11  ;;  %250 = vmatpush3.bf16.msra.mxu0 %v247_v7  ;;  %p327_p5 = por %p326_p4, %p325_p3 }
  0x30   :  { %p328_p6 = pnand %p327_p5, %p321_p2 }
  0x37   :  { %v257_v12 = vpop.eup %256 }
  0x38   :  { %v259_v13 = vpop.eup %258  ;;  %v51_v14 = vadd.f32 1.0, %v257_v12 }
  0x39   :  { %v52_v15 = vadd.f32 1.0, %v259_v13 }
  0x3a   :  { %260 = vrcp.f32 %v51_v14 }
  0x3b   :  { %262 = vrcp.f32 %v52_v15 }
  0x44   :  { %v261_v16 = vpop.eup %260 }
  0x45   :  { %v263_v17 = vpop.eup %262  ;;  %v57_v18 = vmul.f32 %v261_v16, %v43_v5 }
  0x46   :  { %v58_v19 = vmul.f32 %v263_v17, %v44_v6 }
  0x47   :  { %240 = vmatprep.mubr.msk.f32.mxu0 %vm68_vm0, %v57_v18 }
  0x48   :  { %241 = vmatmul.mubr.msk.f32.vlgmr.msra.gmra.mrb[0].mxu0 %vm68_vm0, %v58_v19 }
 0x11b   :  { %v242_v25 = vpop.f32.mrb[0].mxu0 }
 0x11c   :  { %v141_v26 = vpop.f32.mrb[1].mxu0  ;;  %v147_v28 = vadd.f32 %v242_v25, %v67_v24 }
 0x11d   :  { %v142_v27 = vadd.f32 %v141_v26, %v67_v24 }
 0x11f   :  { %150 = vadd.xlane.f32.xlu0 %v142_v27 }
 0x123   :  { %152 = vadd.xlane.f32.xlu0 %v147_v28 }
 0x1ac   :  { %v151_v30 = vpop.xlane.xlu0 %150 }
 0x1ad   :  { %v154_v31 = vmul.f32 0.0625, %v151_v30 }
 0x1af   :  { %v156_v33 = vsub.f32 %v142_v27, %v154_v31 }
 0x1b0   :  { %v153_v34 = vpop.xlane.xlu0 %152 }
 0x1b1   :  { %v155_v35 = vmul.f32 0.0625, %v153_v34  ;;  %v162_v36 = vmul.f32 %v161_v32, %v156_v33 }
 0x1b3   :  { %v157_v37 = vsub.f32 %v147_v28, %v155_v35  ;;  %v164_v38 = vmul.f32 %v162_v36, %v162_v36 }
 0x1b5   :  { %166 = vadd.xlane.f32.xlu1 %v164_v38  ;;  %v163_v39 = vmul.f32 %v161_v32, %v157_v37 }
 0x1b7   :  { %v165_v40 = vmul.f32 %v163_v39, %v163_v39 }
 0x1b9   :  { %168 = vadd.xlane.f32.xlu1 %v165_v40 }
 0x242   :  { %v167_v41 = vpop.xlane.xlu1 %166 }
 0x243   :  { %v170_v42 = vmul.f32 0.0625, %v167_v41 }
 0x245   :  { %v172_v43 = vadd.f32 1e-05, %v170_v42 }
 0x246   :  { %v169_v44 = vpop.xlane.xlu1 %168 }
 0x247   :  { %264 = vrsqrt.f32 %v172_v43  ;;  %v171_v45 = vmul.f32 0.0625, %v169_v44 }
 0x249   :  { %v173_v46 = vadd.f32 1e-05, %v171_v45 }
 0x24b   :  { %266 = vrsqrt.f32 %v173_v46 }
 0x251   :  { %v265_v50 = vpop.eup %264 }
 0x252   :  { %v180_v51 = vmul.f32 %v265_v50, %v179_v48 }
 0x254   :  { %v182_v53 = vmul.f32 %v180_v51, %v162_v36 }
 0x255   :  { %v267_v54 = vpop.eup %266 }
 0x256   :  { %v181_v55 = vmul.f32 %v267_v54, %v179_v48  ;;  %v188_v56 = vadd.f32 %v187_v52, %v182_v53 }
 0x258   :  { %v183_v57 = vmul.f32 %v181_v55, %v163_v39  ;;  %v190_v58 = vsub.f32 0.0, %v188_v56 }
 0x25a   :  { %v189_v59 = vadd.f32 %v187_v52, %v183_v57  ;;  %v192_v60 = vmul.f32 1.442695, %v190_v58 }
 0x25c   :  { %v191_v61 = vsub.f32 0.0, %v189_v59  ;;  %268 = vpow2.f32 %v192_v60 }
 0x25e   :  { %v194_v62 = vmul.f32 1.442695, %v191_v61 }
 0x260   :  { %270 = vpow2.f32 %v194_v62 }
 0x266   :  { %v269_v63 = vpop.eup %268 }
 0x267   :  { %v196_v0 = vadd.f32 1.0, %v269_v63 }
 0x269   :  { %272 = vrcp.f32 %v196_v0 }
 0x26a   :  { %v271_v1 = vpop.eup %270 }
 0x26b   :  { %v197_v2 = vadd.f32 1.0, %v271_v1 }
 0x26d   :  { %274 = vrcp.f32 %v197_v2 }
 0x273   :  { %v273_v3 = vpop.eup %272 }
 0x274   :  { %v202_v4 = vmul.f32 %v273_v3, %v188_v56 }
 0x276   :  { %204 = vst [vmem:[#allocation7] sm:$0xff] %v202_v4 }
 0x277   :  { %v275_v5 = vpop.eup %274 }
 0x278   :  { %v203_v6 = vmul.f32 %v275_v5, %v189_v59 }
 0x27a   :  { %205 = vst [vmem:[#allocation7 + $0x8] sm:$0xff] %v203_v6 }
 0x27b   :  { %331 = shalt.err (!%p328_p6)
}
 0x27c   :  { %s332_s15 = scalar_lea.hbm %s424_s3, 256 }
 0x27d   :  { %p333_p7 = scmp.ne.s32.totalorder %s424_s3, %s332_s15  ;;  %p336_p8 = scmp.lt.u32.totalorder %s332_s15, %s424_s3 }
 0x27f   :  { %p338_p9 = pnand %p336_p8, %p333_p7 }
 0x281   :  { %341 = shalt.err (!%p338_p9)
}
 0x282   :  { %217 = dma.vmem_to_hbm [thread:$0]  %s212_s11, 256, %s424_s3, [#allocation4], %s349_s22, %s349_s22, %s350_s23  }
 0x283   :  { %346 = dma.done.wait [#allocation4], 256  }
 0x284   :  { %347 = vsyncadd [#allocation4], 4294967040 }
 0x285   :  { %221 = vsyncpa [#allocation3], 1 }
 0x286   :  { %222 = vsyncpa [#allocation6], 1 }
 0x287   :  { %223 = vsyncpa [#allocation4], 1 }

</bundles_post_ra>
